<compile_context>
chip_gen: v7x
topology: tpu7x:2x2x1
jax: 0.10.0
libtpu: 0.0.40
codegen_flags: <defaults>
</compile_context>

<pallas_src>
import jax
import jax.numpy as jnp
import numpy as np
from jax.experimental import pallas as pl
from jax.experimental.pallas import tpu as pltpu


def _state_repr_kernel(x0_ref, x1_ref, fair_ref,
                       att_w_ref, att_b_ref, fav_w_ref, fav_b_ref,
                       ups_ref, fs_ref):
    TB, S, E = x0_ref.shape
    G = fair_ref.shape[1]

    # ---- items = x0 + x1 (fused; never materialized in HBM) ------------------
    items = x0_ref[...].astype(jnp.float32) + x1_ref[...].astype(jnp.float32)

    # ---- attention scores: eij = tanh(items . w + b) --------------------------
    # Attention weight arrives as a (1, E) row so the (E, 1) projection becomes
    # a lane reduction instead of a 1-wide matmul.
    w = att_w_ref[...].astype(jnp.float32)                  # (1, E)
    eij = jnp.sum(items * w[None, :, :], axis=-1)           # (TB, S)
    eij = jnp.tanh(eij + att_b_ref[...])                    # bias (1, S) broadcast
    a = jnp.exp(eij)                                        # tanh bounds eij -> exp safe
    denom = jnp.sum(a, axis=1, keepdims=True) + 1e-10       # (TB, 1)
    a = a * pl.reciprocal(denom, approx=True)               # EUP slot (~free)

    # ---- attention pooling over the step dim ----------------------------------
    if S >= 64:
        # Production-sized S: route the contraction to the MXU.
        ups = jnp.einsum("bus,bse->bue", a[:, None, :], items,
                         preferred_element_type=jnp.float32)[:, 0, :]
    else:
        # Tiny S: broadcast-multiply + sublane reduce beats an MXU push/pop.
        ups = jnp.sum(items * a[:, :, None], axis=1)        # (TB, E)

    # ---- fs = relu(fair @ fav_w^T + fav_b) -------------------------------------
    fair = fair_ref[...].astype(jnp.float32)                # (TB, G)
    fav_w = fav_w_ref[...].astype(jnp.float32)              # (G, E)
    fav_b = fav_b_ref[...].astype(jnp.float32)              # (1, E)
    if G <= 16:
        # Tiny G: keep the projection on the VPU (G broadcast FMAs, unrolled).
        fs = fav_b + fair[:, 0:1] * fav_w[0:1, :]
        for g in range(1, G):
            fs = fs + fair[:, g:g + 1] * fav_w[g:g + 1, :]
    else:
        fs = jnp.dot(fair, fav_w, preferred_element_type=jnp.float32) + fav_b
    fs = jnp.maximum(fs, 0.0)

    # ---- lane-dense, offset-0, full-buffer stores ------------------------------
    ups_ref[...] = ups.astype(ups_ref.dtype)
    fs_ref[...] = fs.astype(fs_ref.dtype)


def _as_bse(a):
    """torch-style .squeeze() that never collapses the leading batch axis."""
    if a.ndim > 3:
        drop = tuple(ax for ax in range(1, a.ndim) if a.shape[ax] == 1)
        if drop:
            a = jnp.squeeze(a, axis=drop)
    if a.ndim != 3:
        raise ValueError(f"items must be rank-3 (B, S, E); got shape {a.shape}")
    return a


def _pick_batch_tile(batch, step, feat, vmem_budget_bytes=8 * 1024 * 1024):
    """Largest batch tile whose double-buffered f32 item inputs fit the budget.

    Budget is conservative so the same tile fits v7x (64 MiB VMEM / 32 MiB
    scoped default) as well as v5e/v6e, with plenty of headroom.
    """
    per_row = 2 * 2 * step * feat * 4        # two item inputs x 2 buffers x f32
    tb = max(1, vmem_budget_bytes // per_row)
    if tb >= batch:
        return batch                         # one block covers the whole batch
    return max(8, (tb // 8) * 8)             # keep (TB, *) 2-D blocks sublane-aligned


def fair_rec_state_repr(x, params, *, batch_tile=None):
    """x = (x0, x1, x2, x3) mirroring the PyTorch module's tuple input."""
    x0, x1, x2, x3 = x
    att_w, att_b, fav_w, fav_b = params

    x0 = _as_bse(x0)
    x1 = _as_bse(x1)
    B, S, E = x0.shape
    G = x2.shape[1]
    out_dtype = jnp.result_type(x0.dtype, x1.dtype)

    if batch_tile is None:
        TB = _pick_batch_tile(B, S, E)
    else:
        TB = min(int(batch_tile), B)
        if TB != B and TB % 8 != 0:
            raise ValueError("batch_tile must cover B or be a multiple of 8")
    grid = (pl.cdiv(B, TB),)

    # Parameters presented lane-major (E on the lane axis).
    att_w_row = att_w.reshape(1, E)          # (E, 1) weight as a row
    att_b_row = att_b.reshape(1, S)
    fav_w_t = fav_w.T                        # (G, E): right operand of fair @ W^T
    fav_b_row = fav_b.reshape(1, E)

    batched3 = lambda i: (i, 0, 0)           # noqa: E731
    batched2 = lambda i: (i, 0)              # noqa: E731
    replicated = lambda i: (0, 0)            # noqa: E731

    ups, fs = pl.pallas_call(
        _state_repr_kernel,
        out_shape=(jax.ShapeDtypeStruct((B, E), out_dtype),
                   jax.ShapeDtypeStruct((B, E), out_dtype)),
        grid=grid,
        in_specs=[
            pl.BlockSpec((TB, S, E), batched3),   # x0
            pl.BlockSpec((TB, S, E), batched3),   # x1
            pl.BlockSpec((TB, G), batched2),      # fairness allocation
            pl.BlockSpec((1, E), replicated),     # attention weight (row)
            pl.BlockSpec((1, S), replicated),     # attention bias
            pl.BlockSpec((G, E), replicated),     # fav weight (transposed)
            pl.BlockSpec((1, E), replicated),     # fav bias
        ],
        out_specs=(pl.BlockSpec((TB, E), batched2),
                   pl.BlockSpec((TB, E), batched2)),
        compiler_params=pltpu.CompilerParams(
            dimension_semantics=("parallel",)),
    )(x0, x1, x2, att_w_row, att_b_row, fav_w_t, fav_b_row)

    # `user` is a pure pass-through in the module; concat on the small (B, 3E)
    # tensor in the wrapper instead of shuttling it through the kernel.
    return jnp.concatenate([x3.astype(out_dtype), ups, fs], axis=1)


def _reference(x, params):
    """Pure-JAX reference mirroring the PyTorch semantics."""
    x0, x1, x2, x3 = x
    att_w, att_b, fav_w, fav_b = params
    items = _as_bse(x0) + _as_bse(x1)
    B, S, E = items.shape
    eij = (items.reshape(-1, E) @ att_w).reshape(-1, S) + att_b
    eij = jnp.tanh(eij)
    a = jnp.exp(eij)
    a = a / (jnp.sum(a, axis=1, keepdims=True) + 1e-10)
    ups = jnp.sum(items * a[:, :, None], axis=1)
    fs = jax.nn.relu(x2 @ fav_w.T + fav_b)
    return jnp.concatenate([x3, ups, fs], axis=1)


def make_params(key, embedding_dim, state_size, n_groups):
    k1, k2 = jax.random.split(key, 2)
    # Attention.weight: (E, 1), kaiming_uniform_ (fan_in = 1 -> bound = sqrt(6))
    bound = float(np.sqrt(6.0))
    att_w = jax.random.uniform(k1, (embedding_dim, 1), jnp.float32,
                               minval=-bound, maxval=bound)
    att_b = jnp.zeros((state_size,), jnp.float32)
    # fav: Linear(n_groups, embedding_dim); weight uniform_[0,1), bias zero
    fav_w = jax.random.uniform(k2, (embedding_dim, n_groups), jnp.float32)
    fav_b = jnp.zeros((embedding_dim,), jnp.float32)
    return att_w, att_b, fav_w, fav_b


if __name__ == "__main__":
    S, E, G = 8, 32, 4            # step_dim (state_size), embedding_dim, n_groups

    key = jax.random.PRNGKey(0)
    kp, key = jax.random.split(key)
    params = make_params(kp, E, S, G)

    def run_case(case_key, batch, batch_tile=None):
        kx0, kx1, kx2, kx3 = jax.random.split(case_key, 4)
        x0 = jax.random.normal(kx0, (batch, S, E), jnp.float32)  # item emb part 1
        x1 = jax.random.normal(kx1, (batch, S, E), jnp.float32)  # item emb part 2
        x2 = jax.random.uniform(kx2, (batch, G), jnp.float32)    # fairness alloc
        x3 = jax.random.normal(kx3, (batch, E), jnp.float32)     # user embedding

        out = jax.block_until_ready(
            fair_rec_state_repr((x0, x1, x2, x3), params, batch_tile=batch_tile))
        ref = jax.block_until_ready(_reference((x0, x1, x2, x3), params))
        assert out.shape == (batch, 3 * E), out.shape
        # Tolerance accounts for pl.reciprocal(approx=True) in the softmax
        # normalization (EUP reciprocal, ~1e-4 relative); user/fs are exact.
        np.testing.assert_allclose(np.asarray(out), np.asarray(ref),
                                   rtol=5e-3, atol=5e-3)

    k_small, k_big = jax.random.split(key)
    run_case(k_small, batch=2)                 # small single-block case
    run_case(k_big, batch=32, batch_tile=8)    # 4-step pipelined, batch-tiled grid

    print("KERNEL_OK")
</pallas_src>

<mosaic_0001>
module attributes {stable_mosaic.version = 11 : i64} {
  func.func @_state_repr_kernel(%arg0: i32, %arg1: memref<2x8x32xf32, #tpu.memory_space<vmem>>, %arg2: memref<2x8x32xf32, #tpu.memory_space<vmem>>, %arg3: memref<2x4xf32, #tpu.memory_space<vmem>>, %arg4: memref<1x32xf32, #tpu.memory_space<vmem>>, %arg5: memref<1x8xf32, #tpu.memory_space<vmem>>, %arg6: memref<4x32xf32, #tpu.memory_space<vmem>>, %arg7: memref<1x32xf32, #tpu.memory_space<vmem>>, %arg8: memref<2x32xf32, #tpu.memory_space<vmem>>, %arg9: memref<2x32xf32, #tpu.memory_space<vmem>>) attributes {dimension_semantics = [#tpu.dimension_semantics<parallel>], iteration_bounds = array<i64: 1>, scalar_prefetch = 0 : i64, scratch_operands = 0 : i64, tpu.core_type = #tpu.core_type<tc>, window_params = [{transform_indices = @transform_0, window_bounds = array<i64: 2, 8, 32>}, {transform_indices = @transform_1, window_bounds = array<i64: 2, 8, 32>}, {transform_indices = @transform_2, window_bounds = array<i64: 2, 4>}, {pipeline_mode = #tpu.pipeline_mode<synchronous>, transform_indices = @transform_3, window_bounds = array<i64: 1, 32>}, {pipeline_mode = #tpu.pipeline_mode<synchronous>, transform_indices = @transform_4, window_bounds = array<i64: 1, 8>}, {pipeline_mode = #tpu.pipeline_mode<synchronous>, transform_indices = @transform_5, window_bounds = array<i64: 4, 32>}, {pipeline_mode = #tpu.pipeline_mode<synchronous>, transform_indices = @transform_6, window_bounds = array<i64: 1, 32>}, {transform_indices = @transform_7, window_bounds = array<i64: 2, 32>}, {transform_indices = @transform_8, window_bounds = array<i64: 2, 32>}]} {
    %c0 = arith.constant 0 : index
    %c0_0 = arith.constant 0 : index
    %c0_1 = arith.constant 0 : index
    %0 = vector.load %arg1[%c0, %c0_0, %c0_1] : memref<2x8x32xf32, #tpu.memory_space<vmem>>, vector<2x8x32xf32>
    %c0_2 = arith.constant 0 : index
    %c0_3 = arith.constant 0 : index
    %c0_4 = arith.constant 0 : index
    %1 = vector.load %arg2[%c0_2, %c0_3, %c0_4] : memref<2x8x32xf32, #tpu.memory_space<vmem>>, vector<2x8x32xf32>
    %2 = arith.addf %0, %1 : vector<2x8x32xf32>
    %c0_5 = arith.constant 0 : index
    %c0_6 = arith.constant 0 : index
    %3 = vector.load %arg4[%c0_5, %c0_6] : memref<1x32xf32, #tpu.memory_space<vmem>>, vector<1x32xf32>
    %4 = vector.shape_cast %3 : vector<1x32xf32> to vector<1x1x32xf32>
    %5 = vector.broadcast %4 : vector<1x1x32xf32> to vector<2x8x32xf32>
    %6 = arith.mulf %2, %5 : vector<2x8x32xf32>
    %cst = arith.constant dense<0.000000e+00> : vector<2x8xf32>
    %7 = vector.multi_reduction <add>, %6, %cst [2] : vector<2x8x32xf32> to vector<2x8xf32>
    %c0_7 = arith.constant 0 : index
    %c0_8 = arith.constant 0 : index
    %8 = vector.load %arg5[%c0_7, %c0_8] : memref<1x8xf32, #tpu.memory_space<vmem>>, vector<1x8xf32>
    %9 = vector.broadcast %8 : vector<1x8xf32> to vector<2x8xf32>
    %10 = arith.addf %7, %9 : vector<2x8xf32>
    %11 = math.tanh %10 : vector<2x8xf32>
    %12 = math.exp %11 : vector<2x8xf32>
    %cst_9 = arith.constant dense<0.000000e+00> : vector<2xf32>
    %13 = vector.multi_reduction <add>, %12, %cst_9 [1] : vector<2x8xf32> to vector<2xf32>
    %14 = vector.shape_cast %13 : vector<2xf32> to vector<2x1xf32>
    %cst_10 = arith.constant 1.000000e-10 : f32
    %15 = vector.broadcast %cst_10 : f32 to vector<2x1xf32>
    %16 = arith.addf %14, %15 : vector<2x1xf32>
    %17 = tpu.reciprocal %16 {approx = true} : vector<2x1xf32> -> vector<2x1xf32>
    %18 = vector.broadcast %17 : vector<2x1xf32> to vector<2x8xf32>
    %19 = arith.mulf %12, %18 : vector<2x8xf32>
    %20 = vector.shape_cast %19 : vector<2x8xf32> to vector<2x8x1xf32>
    %21 = vector.broadcast %20 : vector<2x8x1xf32> to vector<2x8x32xf32>
    %22 = arith.mulf %2, %21 : vector<2x8x32xf32>
    %cst_11 = arith.constant dense<0.000000e+00> : vector<2x32xf32>
    %23 = vector.multi_reduction <add>, %22, %cst_11 [1] : vector<2x8x32xf32> to vector<2x32xf32>
    %c0_12 = arith.constant 0 : index
    %c0_13 = arith.constant 0 : index
    %24 = vector.load %arg3[%c0_12, %c0_13] : memref<2x4xf32, #tpu.memory_space<vmem>>, vector<2x4xf32>
    %c0_14 = arith.constant 0 : index
    %c0_15 = arith.constant 0 : index
    %25 = vector.load %arg6[%c0_14, %c0_15] : memref<4x32xf32, #tpu.memory_space<vmem>>, vector<4x32xf32>
    %c0_16 = arith.constant 0 : index
    %c0_17 = arith.constant 0 : index
    %26 = vector.load %arg7[%c0_16, %c0_17] : memref<1x32xf32, #tpu.memory_space<vmem>>, vector<1x32xf32>
    %27 = vector.extract_strided_slice %24 {offsets = [0, 0], sizes = [2, 1], strides = [1, 1]} : vector<2x4xf32> to vector<2x1xf32>
    %28 = vector.extract_strided_slice %25 {offsets = [0, 0], sizes = [1, 32], strides = [1, 1]} : vector<4x32xf32> to vector<1x32xf32>
    %29 = vector.broadcast %27 : vector<2x1xf32> to vector<2x32xf32>
    %30 = vector.broadcast %28 : vector<1x32xf32> to vector<2x32xf32>
    %31 = arith.mulf %29, %30 : vector<2x32xf32>
    %32 = vector.broadcast %26 : vector<1x32xf32> to vector<2x32xf32>
    %33 = arith.addf %32, %31 : vector<2x32xf32>
    %34 = vector.extract_strided_slice %24 {offsets = [0, 1], sizes = [2, 1], strides = [1, 1]} : vector<2x4xf32> to vector<2x1xf32>
    %35 = vector.extract_strided_slice %25 {offsets = [1, 0], sizes = [1, 32], strides = [1, 1]} : vector<4x32xf32> to vector<1x32xf32>
    %36 = vector.broadcast %34 : vector<2x1xf32> to vector<2x32xf32>
    %37 = vector.broadcast %35 : vector<1x32xf32> to vector<2x32xf32>
    %38 = arith.mulf %36, %37 : vector<2x32xf32>
    %39 = arith.addf %33, %38 : vector<2x32xf32>
    %40 = vector.extract_strided_slice %24 {offsets = [0, 2], sizes = [2, 1], strides = [1, 1]} : vector<2x4xf32> to vector<2x1xf32>
    %41 = vector.extract_strided_slice %25 {offsets = [2, 0], sizes = [1, 32], strides = [1, 1]} : vector<4x32xf32> to vector<1x32xf32>
    %42 = vector.broadcast %40 : vector<2x1xf32> to vector<2x32xf32>
    %43 = vector.broadcast %41 : vector<1x32xf32> to vector<2x32xf32>
    %44 = arith.mulf %42, %43 : vector<2x32xf32>
    %45 = arith.addf %39, %44 : vector<2x32xf32>
    %46 = vector.extract_strided_slice %24 {offsets = [0, 3], sizes = [2, 1], strides = [1, 1]} : vector<2x4xf32> to vector<2x1xf32>
    %47 = vector.extract_strided_slice %25 {offsets = [3, 0], sizes = [1, 32], strides = [1, 1]} : vector<4x32xf32> to vector<1x32xf32>
    %48 = vector.broadcast %46 : vector<2x1xf32> to vector<2x32xf32>
    %49 = vector.broadcast %47 : vector<1x32xf32> to vector<2x32xf32>
    %50 = arith.mulf %48, %49 : vector<2x32xf32>
    %51 = arith.addf %45, %50 : vector<2x32xf32>
    %cst_18 = arith.constant 0.000000e+00 : f32
    %52 = vector.broadcast %cst_18 : f32 to vector<2x32xf32>
    %53 = arith.maximumf %51, %52 : vector<2x32xf32>
    %c0_19 = arith.constant 0 : index
    %c0_20 = arith.constant 0 : index
    %54 = vector.load %arg8[%c0_19, %c0_20] : memref<2x32xf32, #tpu.memory_space<vmem>>, vector<2x32xf32>
    tpu.vector_store %arg8[%c0_19, %c0_20], %23 {strides = array<i32>} : memref<2x32xf32, #tpu.memory_space<vmem>>, vector<2x32xf32>,
    %c0_21 = arith.constant 0 : index
    %c0_22 = arith.constant 0 : index
    %55 = vector.load %arg9[%c0_21, %c0_22] : memref<2x32xf32, #tpu.memory_space<vmem>>, vector<2x32xf32>
    tpu.vector_store %arg9[%c0_21, %c0_22], %53 {strides = array<i32>} : memref<2x32xf32, #tpu.memory_space<vmem>>, vector<2x32xf32>,
    return
  }
  func.func @transform_0(%arg0: i32) -> (i32, i32, i32) {
    %c0_i32 = arith.constant 0 : i32
    %c0_i32_0 = arith.constant 0 : i32
    %c0_i32_1 = arith.constant 0 : i32
    return %arg0, %c0_i32, %c0_i32_0 : i32, i32, i32
  }
  func.func @transform_1(%arg0: i32) -> (i32, i32, i32) {
    %c0_i32 = arith.constant 0 : i32
    %c0_i32_0 = arith.constant 0 : i32
    %c0_i32_1 = arith.constant 0 : i32
    return %arg0, %c0_i32, %c0_i32_0 : i32, i32, i32
  }
  func.func @transform_2(%arg0: i32) -> (i32, i32) {
    %c0_i32 = arith.constant 0 : i32
    %c0_i32_0 = arith.constant 0 : i32
    return %arg0, %c0_i32 : i32, i32
  }
  func.func @transform_3(%arg0: i32) -> (i32, i32) {
    %c0_i32 = arith.constant 0 : i32
    %c0_i32_0 = arith.constant 0 : i32
    %c0_i32_1 = arith.constant 0 : i32
    return %c0_i32, %c0_i32_0 : i32, i32
  }
  func.func @transform_4(%arg0: i32) -> (i32, i32) {
    %c0_i32 = arith.constant 0 : i32
    %c0_i32_0 = arith.constant 0 : i32
    %c0_i32_1 = arith.constant 0 : i32
    return %c0_i32, %c0_i32_0 : i32, i32
  }
  func.func @transform_5(%arg0: i32) -> (i32, i32) {
    %c0_i32 = arith.constant 0 : i32
    %c0_i32_0 = arith.constant 0 : i32
    %c0_i32_1 = arith.constant 0 : i32
    return %c0_i32, %c0_i32_0 : i32, i32
  }
  func.func @transform_6(%arg0: i32) -> (i32, i32) {
    %c0_i32 = arith.constant 0 : i32
    %c0_i32_0 = arith.constant 0 : i32
    %c0_i32_1 = arith.constant 0 : i32
    return %c0_i32, %c0_i32_0 : i32, i32
  }
  func.func @transform_7(%arg0: i32) -> (i32, i32) {
    %c0_i32 = arith.constant 0 : i32
    %c0_i32_0 = arith.constant 0 : i32
    return %arg0, %c0_i32 : i32, i32
  }
  func.func @transform_8(%arg0: i32) -> (i32, i32) {
    %c0_i32 = arith.constant 0 : i32
    %c0_i32_0 = arith.constant 0 : i32
    return %arg0, %c0_i32 : i32, i32
  }
}

</mosaic_0001>

<bundles_post_ra>
// kernel: tpu_custom_call.1
= control target key start
LH: loop header
LB: loop body
LE: loop exit
PB: predicated region body
PF: predicated region fallthrough
CT: control target
= control target key end

     0   :  { %14 = vsyncpa [#allocation3], 0  ;;  %s509_s0 = inlined_call_operand.hbm [shape: f32[2,8,32], index: 0, kind: input, shape index: {}]   ;;  %s510_s1 = inlined_call_operand.hbm [shape: f32[2,8,32], index: 1, kind: input, shape index: {}]   ;;  %s511_s2 = inlined_call_operand.vmem [shape: f32[2,4], index: 2, kind: input, shape index: {}]   ;;  %s512_s3 = inlined_call_operand.vmem [shape: f32[1,32], index: 3, kind: input, shape index: {}]   ;;  %s513_s4 = inlined_call_operand.vmem [shape: f32[1,8], index: 4, kind: input, shape index: {}]   ;;  %s514_s5 = inlined_call_operand.vmem [shape: f32[4,32], index: 5, kind: input, shape index: {}]   ;;  %s515_s6 = inlined_call_operand.vmem [shape: f32[1,32], index: 6, kind: input, shape index: {}]   ;;  %s516_s7 = inlined_call_operand.hbm [shape: f32[2,32], index: 7, kind: output, shape index: {0}]   ;;  %s517_s8 = inlined_call_operand.hbm [shape: f32[2,32], index: 8, kind: output, shape index: {1}]  }
   0x1   :  { %15 = vsyncpa [#allocation6], 0 }
   0x2   :  { %16 = vsyncpa [#allocation4], 0 }
   0x3   :  { %17 = vsyncpa [#allocation9], 0  ;;  %s377_s27 = smov [#allocation2]   ;;  %s281_s9 = scalar_lea.hbm %s509_s0, 256 }
   0x4   :  { %s23_s28 = sshll.u32 %s377_s27, 4  ;;  %p282_p0 = scmp.ne.s32.totalorder %s509_s0, %s281_s9  ;;  %s24_s28 = int_to_ptr.vmem [resolvable:$true] %s23_s28 }
   0x5   :  { %p285_p1 = scmp.lt.u32.totalorder %s281_s9, %s509_s0 }
   0x7   :  { %p287_p2 = pnand %p285_p1, %p282_p0 }
   0x9   :  { %290 = shalt.err (!%p287_p2)
}
   0xa   :  { %s291_s14 = scalar_lea.vmem %s24_s28, 256  ;;  %p296_p4 = scmp.lt.s32.totalorder %s24_s28, %s24_s28 }
   0xb   :  { %p292_p3 = scmp.ne.s32.totalorder %s24_s28, %s291_s14  ;;  %p297_p5 = scmp.lt.s32.totalorder %s291_s14, %s291_s14 }
   0xd   :  { %p298_p6 = por %p297_p5, %p296_p4 }
   0xf   :  { %p299_p7 = pnand %p298_p6, %p292_p3 }
  0x11   :  { %302 = shalt.err (!%p299_p7)
}
  0x12   :  { %s378_s15 = smov 128   ;;  %s379_s16 = smov 8  }
  0x13   :  { %29 = dma.hbm_to_vmem [thread:$0]  %s509_s0, 256, %s24_s28, [#allocation3], %s378_s15, %s378_s15, %s379_s16  }
  0x14   :  { %s380_s19 = smov [#allocation5]   ;;  %s303_s23 = scalar_lea.hbm %s510_s1, 256 }
  0x15   :  { %s35_s20 = sshll.u32 %s380_s19, 4  ;;  %p304_p8 = scmp.ne.s32.totalorder %s510_s1, %s303_s23  ;;  %s36_s20 = int_to_ptr.vmem [resolvable:$true] %s35_s20 }
  0x16   :  { %p307_p9 = scmp.lt.u32.totalorder %s303_s23, %s510_s1 }
  0x18   :  { %p309_p10 = pnand %p307_p9, %p304_p8 }
  0x1a   :  { %312 = shalt.err (!%p309_p10)
}
  0x1b   :  { %s313_s29 = scalar_lea.vmem %s36_s20, 256  ;;  %p318_p12 = scmp.lt.s32.totalorder %s36_s20, %s36_s20 }
  0x1c   :  { %p314_p11 = scmp.ne.s32.totalorder %s36_s20, %s313_s29  ;;  %p319_p13 = scmp.lt.s32.totalorder %s313_s29, %s313_s29 }
  0x1e   :  { %p320_p0 = por %p319_p13, %p318_p12 }
  0x20   :  { %p321_p1 = pnand %p320_p0, %p314_p11 }
  0x22   :  { %324 = shalt.err (!%p321_p1)
}
  0x23   :  { %41 = dma.hbm_to_vmem [thread:$0]  %s510_s1, 256, %s36_s20, [#allocation6], %s378_s15, %s378_s15, %s379_s16  }
  0x24   :  { %369 = dma.done.wait [#allocation3], 256  }
  0x25   :  { %370 = vsyncadd [#allocation3], 4294967040 }
  0x26   :  { %371 = dma.done.wait [#allocation6], 256  }
  0x27   :  { %372 = vsyncadd [#allocation6], 4294967040  ;;  %v58_v0 = vld [vmem:[#allocation2] sm:$0xff]  ;;  %v60_v1 = vld [vmem:[#allocation5] sm:$0xff]  ;;  %vm73_vm0 = vcmask 261120   ;;  %v381_v12 = vmov 0   ;;  %v106_v25 = vlaneseq }
  0x28   :  { %v252_v2 = vld [vmem:[%s512_s3] ss:$0 sm:$0xff]  ;;  %v459_v3 = vadd.f32 %v60_v1, %v58_v0  ;;  %v59_v4 = vld [vmem:[#allocation2 + $0x8] sm:$0xff]  ;;  %v61_v5 = vld [vmem:[#allocation5 + $0x8] sm:$0xff]  ;;  %265 = vset.pattern.permute.xlu1 %v381_v12  ;;  %266 = vset.pattern.permute.xlu0 %v381_v12  ;;  %vm116_vm1 = vcmask 1041409   ;;  %vm119_vm2 = vcmask 58368  }
  0x29   :  { %v253_v6 = vld [vmem:[%s513_s4] ss:$0 sm:$0xff]  ;;  %v464_v7 = vadd.f32 %v61_v5, %v59_v4  ;;  %v107_v26 = vand.u32 127, %v106_v25  ;;  %v109_v27 = vshrl.u32 %v106_v25, 7  ;;  %v382_v44 = vmov 1   ;;  %s386_s14 = smov [#allocation8]  }
  0x2a   :  { %87 = vbcast.lane.b32.xlu1 %v253_v6, 256  ;;  %v71_v8 = vmul.f32 %v252_v2, %v459_v3  ;;  %v164_v24 = vld [vmem:[%s511_s2] sm:$0x3]  ;;  %v383_v45 = vmov 2   ;;  %v384_v46 = vmov 3   ;;  %s238_s15 = sshll.u32 %s386_s14, 4  ;;  %s239_s15 = int_to_ptr.vmem [resolvable:$true] %s238_s15 }
  0x2b   :  { %v72_v9 = vmul.f32 %v252_v2, %v464_v7  ;;  %v110_v28 = vsub.s32 %v107_v26, %v109_v27  ;;  %v132_v37 = vsub.s32 1, %v109_v27  ;;  %v128_v38 = vsub.s32 0, %v109_v27  ;;  %v165_v47 = vld [vmem:[%s514_s5] sm:$0xf]  ;;  %s385_s5 = smov [#allocation7]  }
  0x2c   :  { %v74_v10 = vsel %vm73_vm0, %v71_v8, 0.0  ;;  %v200_v52 = vsub.s32 2, %v109_v27  ;;  %v254_v57 = vld [vmem:[%s515_s6] ss:$0 sm:$0xff]  ;;  %v210_v60 = vsub.s32 3, %v109_v27  ;;  %s228_s6 = sshll.u32 %s385_s5, 4  ;;  %s229_s6 = int_to_ptr.vmem [resolvable:$true] %s228_s6 }
  0x2d   :  { %75 = vadd.xlane.f32.xlu0 %v74_v10  ;;  %v77_v11 = vsel %vm73_vm0, %v72_v9, 0.0  ;;  %v175_v49 = vrot.slane %v165_v47, %v128_v38  ;;  %v191_v56 = vrot.slane %v165_v47, %v132_v37  ;;  %vm219_vm3 = vcmask 254976   ;;  %s325_s16 = scalar_lea.vmem %s229_s6, 32  ;;  %p330_p3 = scmp.lt.s32.totalorder %s229_s6, %s229_s6 }
  0x2e   :  { %v201_v63 = vrot.slane %v165_v47, %v200_v52  ;;  %v211_v6 = vrot.slane %v165_v47, %v210_v60  ;;  %p326_p2 = scmp.ne.s32.totalorder %s229_s6, %s325_s16  ;;  %p331_p4 = scmp.lt.s32.totalorder %s325_s16, %s325_s16 }
  0x30   :  { %p332_p5 = por %p331_p4, %p330_p3 }
  0x31   :  { %78 = vadd.xlane.f32.xlu0 %v77_v11 }
  0x32   :  { %p333_p6 = pnand %p332_p5, %p326_p2 }
  0x9c   :  { %v88_v13 = vpop.permute.xlu1 %87 }
  0xba   :  { %v76_v14 = vpop.xlane.xlu0 %75 }
  0xbb   :  { %v90_v15 = vadd.f32 %v88_v13, %v76_v14 }
  0xbd   :  { %271 = vtanh.f32 %v90_v15 }
  0xbe   :  { %v79_v16 = vpop.xlane.xlu0 %78 }
  0xbf   :  { %v91_v17 = vadd.f32 %v88_v13, %v79_v16 }
  0xc1   :  { %273 = vtanh.f32 %v91_v17 }
  0xc7   :  { %v272_v18 = vpop.eup %271 }
  0xc8   :  { %v94_v19 = vmul.f32 1.442695, %v272_v18 }
  0xca   :  { %275 = vpow2.f32 %v94_v19 }
  0xcb   :  { %v274_v20 = vpop.eup %273 }
  0xcc   :  { %v96_v21 = vmul.f32 1.442695, %v274_v20 }
  0xce   :  { %277 = vpow2.f32 %v96_v21 }
  0xd4   :  { %v276_v22 = vpop.eup %275 }
  0xd5   :  { %101 = vperm.xlu1 %265, %v276_v22  }
  0xd8   :  { %v278_v23 = vpop.eup %277 }
  0xd9   :  { %104 = vperm.xlu0 %266, %v278_v23  }
  0xdd   :  { %169 = vperm.xlu0 %266, %v164_v24  }
 0x154   :  { %v102_v29 = vpop.permute.xlu1 %101 }
 0x155   :  { %v111_v31 = vrot.slane %v102_v29, %v110_v28 }
 0x158   :  { %v105_v30 = vpop.permute.xlu0 %104 }
 0x159   :  { %v115_v32 = vrot.slane %v105_v30, %v110_v28 }
 0x15b   :  { %v117_v33 = vsel %vm116_vm1, %v115_v32, %v111_v31 }
 0x15c   :  { %v120_v34 = vsel %vm119_vm2, %v117_v33, 0.0  ;;  %v170_v48 = vpop.permute.xlu0 %169 }
 0x15d   :  { %121 = vadd.xlane.f32.xlu1 %v120_v34  ;;  %v176_v55 = vmul.f32 %v175_v49, %v170_v48 }
 0x15f   :  { %v183_v2 = vadd.f32 %v254_v57, %v176_v55 }
 0x1ea   :  { %v122_v35 = vpop.xlane.xlu1 %121 }
 0x1eb   :  { %v123_v36 = vadd.f32 1e-10, %v122_v35 }
 0x1ed   :  { %279 = vrcp.f32 %v123_v36 }
 0x1f7   :  { %v280_v39 = vpop.eup %279 }
 0x1f8   :  { %v133_v40 = vrot.slane %v280_v39, %v132_v37  ;;  %v129_v41 = vrot.slane %v280_v39, %v128_v38 }
 0x1fa   :  { %v137_v42 = vmul.f32 %v278_v23, %v133_v40  ;;  %v136_v43 = vmul.f32 %v276_v22, %v129_v41 }
 0x1fc   :  { %145 = vperm.xlu0 %266, %v137_v42   ;;  %140 = vperm.xlu1 %265, %v136_v43  }
 0x200   :  { %267 = vset.pattern.permute.xlu0 %v382_v44  ;;  %268 = vset.pattern.permute.xlu1 %v383_v45 }
 0x201   :  { %185 = vperm.xlu0 %267, %v164_v24   ;;  %195 = vperm.xlu1 %268, %v164_v24  }
 0x205   :  { %269 = vset.pattern.permute.xlu1 %v384_v46  ;;  %270 = vset.pattern.permute.xlu0 %v384_v46 }
 0x206   :  { %205 = vperm.xlu1 %269, %v164_v24  }
 0x27b   :  { %v141_v50 = vpop.permute.xlu1 %140  ;;  %v146_v51 = vpop.permute.xlu0 %145 }
 0x27c   :  { %v148_v53 = vmul.f32 %v141_v50, %v459_v3  ;;  %v149_v54 = vmul.f32 %v146_v51, %v464_v7 }
 0x27e   :  { %v150_v58 = vsel %vm73_vm0, %v148_v53, 0.0  ;;  %v157_v59 = vsel %vm73_vm0, %v149_v54, 0.0 }
 0x27f   :  { %v151_v61 = vrot.slane %v150_v58, 4  ;;  %v158_v62 = vrot.slane %v157_v59, 4 }
 0x280   :  { %v196_v0 = vpop.permute.xlu1 %195  ;;  %v186_v1 = vpop.permute.xlu0 %185 }
 0x281   :  { %v152_v3 = vadd.f32 %v151_v61, %v150_v58  ;;  %v159_v4 = vadd.f32 %v158_v62, %v157_v59  ;;  %v192_v5 = vmul.f32 %v191_v56, %v186_v1  ;;  %v202_v9 = vmul.f32 %v201_v63, %v196_v0 }
 0x283   :  { %v153_v7 = vrot.slane %v152_v3, 2  ;;  %v160_v8 = vrot.slane %v159_v4, 2  ;;  %v193_v10 = vadd.f32 %v192_v5, %v183_v2 }
 0x285   :  { %v154_v11 = vadd.f32 %v153_v7, %v152_v3  ;;  %v161_v12 = vadd.f32 %v160_v8, %v159_v4  ;;  %v206_v13 = vpop.permute.xlu1 %205  ;;  %v203_v14 = vadd.f32 %v202_v9, %v193_v10 }
 0x286   :  { %v212_v15 = vmul.f32 %v211_v6, %v206_v13 }
 0x287   :  { %v155_v16 = vrot.slane %v154_v11, 1  ;;  %v162_v17 = vrot.slane %v161_v12, 1 }
 0x288   :  { %v213_v18 = vadd.f32 %v212_v15, %v203_v14 }
 0x289   :  { %v156_v19 = vadd.f32 %v155_v16, %v154_v11  ;;  %v163_v20 = vadd.f32 %v162_v17, %v161_v12 }
 0x28a   :  { %v214_v21 = vmax.f32 %v213_v18, 0.0 }
 0x28b   :  { %v217_v22 = vsel %vm116_vm1, %v163_v20, %v156_v19 }
 0x28c   :  { %220 = vst.msk [vmem:[#allocation7] sm:$0x3] %vm219_vm3, %v217_v22  ;;  %221 = vst.msk [vmem:[#allocation8] sm:$0x3] %vm219_vm3, %v214_v21 }
 0x28d   :  { %336 = shalt.err (!%p333_p6)
}
 0x28e   :  { %s337_s19 = scalar_lea.hbm %s516_s7, 32 }
 0x28f   :  { %p338_p7 = scmp.ne.s32.totalorder %s516_s7, %s337_s19  ;;  %p341_p8 = scmp.lt.u32.totalorder %s337_s19, %s516_s7 }
 0x291   :  { %p343_p9 = pnand %p341_p8, %p338_p7 }
 0x293   :  { %346 = shalt.err (!%p343_p9)
}
 0x294   :  { %231 = dma.vmem_to_hbm [thread:$0]  %s229_s6, 32, %s516_s7, [#allocation4]  }
 0x295   :  { %s347_s26 = scalar_lea.vmem %s239_s15, 32  ;;  %p352_p11 = scmp.lt.s32.totalorder %s239_s15, %s239_s15 }
 0x296   :  { %p348_p10 = scmp.ne.s32.totalorder %s239_s15, %s347_s26  ;;  %p353_p12 = scmp.lt.s32.totalorder %s347_s26, %s347_s26 }
 0x298   :  { %p354_p13 = por %p353_p12, %p352_p11 }
 0x29a   :  { %p355_p0 = pnand %p354_p13, %p348_p10 }
 0x29c   :  { %358 = shalt.err (!%p355_p0)
}
 0x29d   :  { %s359_s0 = scalar_lea.hbm %s517_s8, 32 }
 0x29e   :  { %p360_p1 = scmp.ne.s32.totalorder %s517_s8, %s359_s0  ;;  %p363_p2 = scmp.lt.u32.totalorder %s359_s0, %s517_s8 }
 0x2a0   :  { %p365_p3 = pnand %p363_p2, %p360_p1 }
 0x2a2   :  { %368 = shalt.err (!%p365_p3)
}
 0x2a3   :  { %241 = dma.vmem_to_hbm [thread:$0]  %s239_s15, 32, %s517_s8, [#allocation9]  }
 0x2a4   :  { %373 = dma.done.wait [#allocation4], 32  }
 0x2a5   :  { %374 = vsyncadd [#allocation4], 4294967264 }
 0x2a6   :  { %375 = dma.done.wait [#allocation9], 32  }
 0x2a7   :  { %376 = vsyncadd [#allocation9], 4294967264 }
 0x2a8   :  { %248 = vsyncpa [#allocation3], 1 }
 0x2a9   :  { %249 = vsyncpa [#allocation6], 1 }
 0x2aa   :  { %250 = vsyncpa [#allocation4], 1 }
 0x2ab   :  { %251 = vsyncpa [#allocation9], 1 }

</bundles_post_ra>
